<compile_context>
chip_gen: v6e
topology: v6e:2x2x1
jax: 0.10.0
libtpu: 0.0.40
codegen_flags: <defaults>
</compile_context>

<pallas_src>
import functools

import jax
import jax.numpy as jnp
from jax import lax
from jax.experimental import pallas as pl
from jax.experimental.pallas import tpu as pltpu


def _final_layer_kernel(x_ref, w_ref, b_ref, o_ref, *, eps):
    # x_ref: (TB, H) rows (native dtype); w_ref: (H, D); b_ref: (1, D).
    x = x_ref[...].astype(jnp.float32)

    # LayerNorm over the last dim, no affine, biased variance (PyTorch semantics).
    mu = jnp.mean(x, axis=-1, keepdims=True)
    xc = x - mu
    var = jnp.mean(xc * xc, axis=-1, keepdims=True)
    xn = xc * lax.rsqrt(var + eps)           # f32 stats, rsqrt on the EUP

    # Linear: f32 operands, f32 accumulation (HBM-bound kernel -> MXU slack).
    y = jnp.dot(xn, w_ref[...].astype(jnp.float32),
                preferred_element_type=jnp.float32)
    o_ref[...] = (y + b_ref[...].astype(jnp.float32)).astype(o_ref.dtype)


def _round_up(v, m):
    return ((v + m - 1) // m) * m


def mlp_final_layer(x, weight, bias, *, eps=1e-6, block_rows=1024,
                    out_dtype=None):
    """x: (..., hidden). weight: (hidden, out_dim). bias: (out_dim,).

    Returns (..., out_dim) in `out_dtype` (default: x.dtype), matching
    LayerNorm(eps, elementwise_affine=False) -> Linear.
    """
    lead = x.shape[:-1]
    H = x.shape[-1]
    D = weight.shape[1]
    out_dtype = x.dtype if out_dtype is None else jnp.dtype(out_dtype)

    xf = x.reshape(-1, H)                    # keep native dtype (no f32 copy)
    N = xf.shape[0]

    # Row tile: as large as block_rows for DMA/per-step-overhead amortization,
    # but capped to ~N/8 so v7x's two TensorCores both get grid steps.
    # Multiple of 8 (f32) / 16 (sub-32-bit) for sublane tiling.
    row_align = 8 if xf.dtype.itemsize >= 4 else 16
    tb_cap = pl.cdiv(N, 8)
    TB = max(row_align, min(block_rows, tb_cap))
    TB = _round_up(TB, row_align)
    grid = pl.cdiv(N, TB)                    # ragged last block handled by Pallas

    b2 = bias.reshape(1, D)

    kernel = functools.partial(_final_layer_kernel, eps=float(eps))

    cost = pl.CostEstimate(
        flops=2 * N * H * D + 8 * N * H,     # matmul + LN elementwise
        transcendentals=N,                   # one rsqrt per row
        bytes_accessed=(xf.size * xf.dtype.itemsize
                        + weight.size * weight.dtype.itemsize
                        + D * bias.dtype.itemsize
                        + N * D * out_dtype.itemsize),
    )

    out = pl.pallas_call(
        kernel,
        out_shape=jax.ShapeDtypeStruct((N, D), out_dtype),
        grid_spec=pltpu.PrefetchScalarGridSpec(
            num_scalar_prefetch=0,
            grid=(grid,),
            in_specs=[
                pl.BlockSpec((TB, H), lambda i: (i, 0)),   # activation row tile
                pl.BlockSpec((H, D), lambda i: (0, 0)),    # resident weight
                pl.BlockSpec((1, D), lambda i: (0, 0)),    # resident bias
            ],
            out_specs=pl.BlockSpec((TB, D), lambda i: (i, 0)),
        ),
        compiler_params=pltpu.CompilerParams(
            dimension_semantics=("parallel",)),
        cost_estimate=cost,
    )(xf, weight, b2)

    return out.reshape(*lead, D)


def _reference(x, weight, bias, eps=1e-6):
    """Plain-JAX f32 reference mirroring the PyTorch forward."""
    xf = x.astype(jnp.float32)
    mu = jnp.mean(xf, axis=-1, keepdims=True)
    var = jnp.mean((xf - mu) ** 2, axis=-1, keepdims=True)
    xn = (xf - mu) / jnp.sqrt(var + eps)
    return xn @ weight.astype(jnp.float32) + bias.astype(jnp.float32)


def init_params(key, hidden_size, out_dim):
    """PyTorch nn.Linear-style uniform init, deterministic under `key`."""
    k1, k2 = jax.random.split(key, 2)
    lim = 1.0 / (hidden_size ** 0.5)
    w = jax.random.uniform(k1, (hidden_size, out_dim), jnp.float32, -lim, lim)
    b = jax.random.uniform(k2, (out_dim,), jnp.float32, -lim, lim)
    return w, b


if __name__ == "__main__":
    # Shapes consistent with the module: hidden=32,
    # l_patch_size=4, k_patch_size=2, out_channels=16 -> out_dim = 128.
    hidden_size = 32
    l_patch_size, k_patch_size, out_channels = 4, 2, 16
    out_dim = l_patch_size * k_patch_size * out_channels   # 128 (lane-dense)

    B, Kdim, L = 2, 4, 16          # x: (B, K, L, hidden) -> 128 rows total

    root = jax.random.PRNGKey(0)
    kx, kp = jax.random.split(root, 2)
    x = jax.random.normal(kx, (B, Kdim, L, hidden_size), jnp.float32)
    weight, bias = init_params(kp, hidden_size, out_dim)

    out = mlp_final_layer(x, weight, bias, eps=1e-6)
    jax.block_until_ready(out)

    ref = _reference(x, weight, bias, eps=1e-6)
    assert out.shape == (B, Kdim, L, out_dim)
    assert out.dtype == x.dtype
    assert jnp.allclose(out, ref, atol=2e-2, rtol=2e-2), float(
        jnp.max(jnp.abs(out - ref)))

    print("KERNEL_OK")
</pallas_src>

<mosaic_0001>
module attributes {stable_mosaic.version = 11 : i64} {
  func.func @_final_layer_kernel(%arg0: i32, %arg1: memref<16x32xf32, #tpu.memory_space<vmem>>, %arg2: memref<32x128xf32, #tpu.memory_space<vmem>>, %arg3: memref<1x128xf32, #tpu.memory_space<vmem>>, %arg4: memref<16x128xf32, #tpu.memory_space<vmem>>) attributes {dimension_semantics = [#tpu.dimension_semantics<parallel>], iteration_bounds = array<i64: 8>, scalar_prefetch = 0 : i64, scratch_operands = 0 : i64, tpu.core_type = #tpu.core_type<tc>, window_params = [{transform_indices = @transform_0, window_bounds = array<i64: 16, 32>}, {pipeline_mode = #tpu.pipeline_mode<synchronous>, transform_indices = @transform_1, window_bounds = array<i64: 32, 128>}, {pipeline_mode = #tpu.pipeline_mode<synchronous>, transform_indices = @transform_2, window_bounds = array<i64: 1, 128>}, {transform_indices = @transform_3, window_bounds = array<i64: 16, 128>}]} {
    %c0 = arith.constant 0 : index
    %c0_0 = arith.constant 0 : index
    %0 = vector.load %arg1[%c0, %c0_0] : memref<16x32xf32, #tpu.memory_space<vmem>>, vector<16x32xf32>
    %cst = arith.constant dense<0.000000e+00> : vector<16xf32>
    %1 = vector.multi_reduction <add>, %0, %cst [1] : vector<16x32xf32> to vector<16xf32>
    %2 = vector.shape_cast %1 : vector<16xf32> to vector<16x1xf32>
    %cst_1 = arith.constant 3.200000e+01 : f32
    %3 = vector.broadcast %cst_1 : f32 to vector<16x1xf32>
    %4 = arith.divf %2, %3 : vector<16x1xf32>
    %5 = vector.broadcast %4 : vector<16x1xf32> to vector<16x32xf32>
    %6 = arith.subf %0, %5 : vector<16x32xf32>
    %7 = arith.mulf %6, %6 : vector<16x32xf32>
    %cst_2 = arith.constant dense<0.000000e+00> : vector<16xf32>
    %8 = vector.multi_reduction <add>, %7, %cst_2 [1] : vector<16x32xf32> to vector<16xf32>
    %9 = vector.shape_cast %8 : vector<16xf32> to vector<16x1xf32>
    %cst_3 = arith.constant 3.200000e+01 : f32
    %10 = vector.broadcast %cst_3 : f32 to vector<16x1xf32>
    %11 = arith.divf %9, %10 : vector<16x1xf32>
    %cst_4 = arith.constant 9.99999997E-7 : f32
    %12 = vector.broadcast %cst_4 : f32 to vector<16x1xf32>
    %13 = arith.addf %11, %12 : vector<16x1xf32>
    %14 = math.rsqrt %13 : vector<16x1xf32>
    %15 = vector.broadcast %14 : vector<16x1xf32> to vector<16x32xf32>
    %16 = arith.mulf %6, %15 : vector<16x32xf32>
    %c0_5 = arith.constant 0 : index
    %c0_6 = arith.constant 0 : index
    %17 = vector.load %arg2[%c0_5, %c0_6] : memref<32x128xf32, #tpu.memory_space<vmem>>, vector<32x128xf32>
    %cst_7 = arith.constant dense<0.000000e+00> : vector<16x128xf32>
    %18 = tpu.matmul %16, %17, %cst_7 {dimension_numbers = #tpu.dot_dimension_numbers<[1], [0], [0], [1], [0, 0, 1, 1], [], []>} : vector<16x32xf32>, vector<32x128xf32>, vector<16x128xf32> -> vector<16x128xf32>
    %c0_8 = arith.constant 0 : index
    %c0_9 = arith.constant 0 : index
    %19 = vector.load %arg3[%c0_8, %c0_9] : memref<1x128xf32, #tpu.memory_space<vmem>>, vector<1x128xf32>
    %20 = vector.broadcast %19 : vector<1x128xf32> to vector<16x128xf32>
    %21 = arith.addf %18, %20 : vector<16x128xf32>
    %c0_10 = arith.constant 0 : index
    %c0_11 = arith.constant 0 : index
    %22 = vector.load %arg4[%c0_10, %c0_11] : memref<16x128xf32, #tpu.memory_space<vmem>>, vector<16x128xf32>
    tpu.vector_store %arg4[%c0_10, %c0_11], %21 {strides = array<i32>} : memref<16x128xf32, #tpu.memory_space<vmem>>, vector<16x128xf32>,
    return
  }
  func.func @transform_0(%arg0: i32) -> (i32, i32) {
    %c0_i32 = arith.constant 0 : i32
    %c0_i32_0 = arith.constant 0 : i32
    return %arg0, %c0_i32 : i32, i32
  }
  func.func @transform_1(%arg0: i32) -> (i32, i32) {
    %c0_i32 = arith.constant 0 : i32
    %c0_i32_0 = arith.constant 0 : i32
    %c0_i32_1 = arith.constant 0 : i32
    return %c0_i32, %c0_i32_0 : i32, i32
  }
  func.func @transform_2(%arg0: i32) -> (i32, i32) {
    %c0_i32 = arith.constant 0 : i32
    %c0_i32_0 = arith.constant 0 : i32
    %c0_i32_1 = arith.constant 0 : i32
    return %c0_i32, %c0_i32_0 : i32, i32
  }
  func.func @transform_3(%arg0: i32) -> (i32, i32) {
    %c0_i32 = arith.constant 0 : i32
    %c0_i32_0 = arith.constant 0 : i32
    return %arg0, %c0_i32 : i32, i32
  }
}

</mosaic_0001>

<bundles_post_ra>
// kernel: tpu_custom_call.1
= control target key start
LH: loop header
LB: loop body
LE: loop exit
PB: predicated region body
PF: predicated region fallthrough
CT: control target
= control target key end

     0   :  { %8 = vsyncpa [#allocation3], 0  ;;  %s657_s0 = inlined_call_operand.vmem [shape: f32[128,32], index: 0, kind: input, shape index: {}]   ;;  %s658_s1 = inlined_call_operand.vmem [shape: f32[32,128], index: 1, kind: input, shape index: {}]   ;;  %s659_s2 = inlined_call_operand.vmem [shape: f32[1,128], index: 2, kind: input, shape index: {}]   ;;  %s660_s3 = inlined_call_operand.hbm [shape: f32[128,128], index: 3, kind: output, shape index: {}]  }
   0x1   :  { %10 = vsyncpa [#allocation3 + $0x1], 0  ;;  %s535_s12 = smov 0   ;;  %s537_s13 = smov 0  }
   0x2   :  { %s539_s14 = smov 0   ;;  %s541_s15 = smov 0  }
   0x3 LB: > { %s556_s16 = sadd.s32 4294967295, %s510_s15   ;;  %s372_s17 = sadd.s32 4294967294, %s510_s15   ;;  %s510_s15 = sphi %s541_s15, %s666_s15   ;;  %s506_s14 = sphi %s539_s14, %s665_s14   ;;  %s502_s13 = sphi %s537_s13, %s664_s13   ;;  %s498_s12 = sphi %s535_s12, %s663_s12  }
   0x4   : > { %s560_s18 = sadd.s32 1, %s510_s15   ;;  %s91_s19 = sadd.s32 1, %s506_s14 }
   0x5   : > { %s88_s20 = ssub.s32 %s510_s15, %s560_s18  ;;  %p101_p0 = scmp.ne.s32.totalorder %s506_s14, %s502_s13 }
   0x6   : > { %p89_p1 = scmp.eq.s32.totalorder %s88_s20, 0  ;;  %p102_p2 = scmp.eq.s32.totalorder %s556_s16, 7 }
   0x7   : > { %p107_p3 = scmp.ne.s32.totalorder %s502_s13, %s498_s12  ;;  %p108_p4 = scmp.eq.s32.totalorder %s372_s17, 7 }
   0x8   : > { %s571_s21 = scalar_select %p89_p1, %s506_s14, %s91_s19  }
   0x9   : > { %p573_p5 = por %p102_p2, %p101_p0  ;;  %p577_p6 = por %p108_p4, %p107_p3 }
   0xa   : > { %p375_p7 = scmp.ge.s32.totalorder %s510_s15, 1  ;;  %p141_p8 = scmp.lt.s32.totalorder %s510_s15, 9 }
   0xc   : > { %p142_p9 = pnand %p375_p7, %p141_p8 }
   0xd   : > { %s377_s24 = sshll.u32 (!%p142_p9), %s556_s16, 1  ;;  %s162_s10 = sand.u32 (!%p142_p9), 1, %s502_s13  }
   0xe   : > { %145 = sbr.rel (%p142_p9) target bundleno = 542 (0x21e), region = 32  ;;  %p166_p10 = scmp.lt.s32.totalorder (!%p142_p9), %s377_s24, 15 }
   0xf   : > { %s376_s11 = sshll.u32 (!%p142_p9), %s162_s10, 4  ;;  %s617_s29 = scalar_lea.sflag (!%p142_p9), [#allocation3], %s162_s10 }
  0x10   : > { %s164_s20 = scalar_lea.vmem (!%p142_p9), [#allocation2], %s376_s11 }
  0x13   : > { %s668_s24 = smov (!%p166_p10, %s377_s24), 15  ;;  %vm174_vm0 = vcmask 261120   ;;  %v205_v14 = vld [vmem:[%s658_s1 + $0x18] sm:$0xff]  ;;  %v204_v15 = vld [vmem:[%s658_s1 + $0x10] sm:$0xff]  ;;  %v203_v16 = vld [vmem:[%s658_s1 + $0x8] sm:$0xff] }
  0x14   : > { %s378_s25 = sshll.u32 %s668_s24, 3  ;;  %394 = vmatprep.subr.mxu0 %v205_v14  ;;  %v202_v17 = vld [vmem:[%s658_s1] sm:$0xff]  ;;  %s310_s24 = sshll.u32 %s164_s20, 4  ;;  %s610_s24 = int_to_ptr.vmem [resolvable:$true] %s310_s24 }
  0x15   : > { %s169_s28 = scalar_lea.vmem %s657_s0, %s378_s25  ;;  %395 = vmatpush3.msra.mxu0 %v205_v14  ;;  %v379_v28 = vld [vmem:[%s659_s2] ss:$0 sm:$0xff]  ;;  %s387_s25 = sshll.u32 %s556_s16, 8 }
  0x16   : > { %v172_v0 = vld [vmem:[%s169_s28] sm:$0xff]  ;;  %v173_v1 = vld [vmem:[%s169_s28 + $0x8] sm:$0xff]  ;;  %396 = vmatprep.subr.mxu0 %v204_v15  ;;  %s615_s28 = scalar_lea.hbm %s660_s3, %s387_s25  ;;  %s450_s30 = scalar_lea.vmem %s610_s24, 256 }
  0x17   : > { %v175_v2 = vsel %vm174_vm0, %v172_v0, 0.0  ;;  %v178_v3 = vsel %vm174_vm0, %v173_v1, 0.0  ;;  %397 = vmatpush3.msra.mxu0 %v204_v15  ;;  %p451_p11 = scmp.ne.s32.totalorder %s610_s24, %s450_s30  ;;  %s512_s16 = smov [#allocation2]  }
  0x18   : > { %176 = vadd.xlane.f32.xlu0 %v175_v2  ;;  %398 = vmatprep.subr.mxu0 %v203_v16  ;;  %s454_s4 = sshll.u32 %s512_s16, 4  ;;  %s455_s4 = int_to_ptr.vmem [resolvable:$false] %s454_s4 }
  0x19   : > { %399 = vmatpush3.msra.mxu0 %v203_v16  ;;  %p452_p12 = pnand %p451_p11, %p573_p5  ;;  %s456_s5 = scalar_lea.vmem %s455_s4, 512 }
  0x1a   : > { %400 = vmatprep.subr.mxu0 %v202_v17  ;;  %p457_p0 = scmp.lt.s32.totalorder %s610_s24, %s455_s4  ;;  %p458_p1 = scmp.lt.s32.totalorder %s456_s5, %s450_s30 }
  0x1b   : > { %401 = vmatpush3.msra.mxu0 %v202_v17  ;;  %p453_p13 = pneg %p452_p12 }
  0x1c   : > { %179 = vadd.xlane.f32.xlu0 %v178_v3  ;;  %p459_p2 = por %p458_p1, %p457_p0 }
  0x1e   : > { %p460_p3 = pnand %p459_p2, %p453_p13 }
  0xa1   : > { %v177_v4 = vpop.xlane.xlu0 %176 }
  0xa2   : > { %v182_v5 = vmul.f32 0.03125, %v177_v4 }
  0xa4   : > { %v184_v6 = vsub.f32 %v172_v0, %v182_v5 }
  0xa5   : > { %v180_v7 = vpop.xlane.xlu0 %179 }
  0xa6   : > { %v183_v8 = vmul.f32 0.03125, %v180_v7  ;;  %v186_v9 = vmul.f32 %v184_v6, %v184_v6 }
  0xa8   : > { %v185_v10 = vsub.f32 %v173_v1, %v183_v8  ;;  %v188_v11 = vsel %vm174_vm0, %v186_v9, 0.0 }
  0xa9   : > { %189 = vadd.xlane.f32.xlu1 %v188_v11 }
  0xaa   : > { %v187_v12 = vmul.f32 %v185_v10, %v185_v10 }
  0xac   : > { %v191_v13 = vsel %vm174_vm0, %v187_v12, 0.0 }
  0xad   : > { %192 = vadd.xlane.f32.xlu1 %v191_v13 }
 0x132   : > { %v190_v18 = vpop.xlane.xlu1 %189 }
 0x133   : > { %v194_v19 = vmul.f32 0.03125, %v190_v18 }
 0x135   : > { %v196_v20 = vadd.f32 1e-06, %v194_v19 }
 0x136   : > { %v193_v21 = vpop.xlane.xlu1 %192 }
 0x137   : > { %446 = vrsqrt.f32 %v196_v20  ;;  %v195_v22 = vmul.f32 0.03125, %v193_v21 }
 0x139   : > { %v197_v23 = vadd.f32 1e-06, %v195_v22 }
 0x13b   : > { %448 = vrsqrt.f32 %v197_v23 }
 0x144   : > { %v447_v24 = vpop.eup %446 }
 0x145   : > { %v200_v25 = vmul.f32 %v447_v24, %v184_v6 }
 0x147   : > { %402 = vmatprep.mubr.msk.f32.mxu0 %vm174_vm0, %v200_v25 }
 0x148   : > { %v449_v26 = vpop.eup %448 }
 0x149   : > { %v201_v27 = vmul.f32 %v449_v26, %v185_v10 }
 0x14b   : > { %403 = vmatmul.mubr.msk.f32.vlgmr.msra.gmra.mxu0 %vm174_vm0, %v201_v27 }
 0x20b   : > { %v404_v29 = vpop.f32.mrf.mxu0 }
 0x20c   : > { %v291_v30 = vadd.f32 %v404_v29, %v379_v28 }
 0x20d   : > { %v285_v31 = vpop.f32.mrf.mxu0 }
 0x20e   : > { %295 = vst [vmem:[%s164_s20 + $0x8] sm:$0xff] %v291_v30  ;;  %v286_v32 = vadd.f32 %v379_v28, %v285_v31 }
 0x210   : > { %294 = vst [vmem:[%s164_s20] sm:$0xff] %v286_v32 }
 0x211   : > { %463 = shalt.err (!%p460_p3)
}
 0x212   : > { %s464_s6 = scalar_lea.hbm %s615_s28, 256  ;;  %s468_s9 = scalar_lea.hbm %s660_s3, 2048 }
 0x213   : > { %p465_p4 = scmp.ne.s32.totalorder %s615_s28, %s464_s6  ;;  %p469_p9 = scmp.lt.s32.totalorder %s615_s28, %s660_s3 }
 0x214   : > { %p470_p10 = scmp.lt.s32.totalorder %s468_s9, %s464_s6 }
 0x215   : > { %p466_p7 = pnand %p465_p4, %p573_p5 }
 0x216   : > { %p471_p11 = por %p470_p10, %p469_p9 }
 0x217   : > { %p467_p8 = pneg %p466_p7 }
 0x219   : > { %p472_p12 = pnand %p471_p11, %p467_p8 }
 0x21b   : > { %475 = shalt.err (!%p472_p12)
}
 0x21c   : > { %s513_s17 = smov 128   ;;  %s514_s19 = smov 8  }
 0x21d   : > { %405 = dma.vmem_to_hbm [thread:$0]  (%p573_p5), %s610_s24, 256, %s615_s28, %s617_s29, %s513_s17, %s513_s17, %s514_s19  }
 0x21e PF: > { %p411_p13 = scmp.ge.s32.totalorder %s510_s15, 2  ;;  %s325_s20 = sand.u32 1, %s498_s12  }
 0x21f   : > { %s326_s25 = scalar_lea.sflag [#allocation3], %s325_s20 }
 0x220   : > { %p408_p0 = pnand %p411_p13, %p577_p6 }
 0x222   : > { %p409_p1 = pneg %p408_p0 }
 0x224   : > { %493 = dma.done.wait (%p409_p1), %s326_s25, 256  }
 0x225   : > { %495 = vsyncadd (%p409_p1), %s326_s25, 4294967040  ;;  %p13_p2 = scmp.ge.s32.totalorder %s560_s18, 10   ;;  %s663_s12 = smov %s502_s13 }
 0x226   : > { %s664_s13 = smov %s506_s14  ;;  %s665_s14 = smov %s571_s21 }
 0x227   : > { %s666_s15 = smov %s560_s18  ;;  %15 = sbr.rel (!%p13_p2) target bundleno = 3 (0x3), region = 67 }
 0x22c   :  { %331 = vsyncpa [#allocation3], 1 }
 0x22d   :  { %333 = vsyncpa [#allocation3 + $0x1], 1 }

</bundles_post_ra>
